<compile_context>
chip_gen: v7x
topology: tpu7x:2x2x1
jax: 0.10.0
libtpu: 0.0.40
codegen_flags: <defaults>
</compile_context>

<pallas_src>
import jax
import jax.numpy as jnp
from jax.experimental import pallas as pl
from jax.experimental.pallas import tpu as pltpu


def _time_embedding_kernel(x_ref, w1_ref, b1_ref, w2_ref, b2_ref, o_ref):
    # linear_1 : bf16 inputs, f32 accumulation on the MXU.
    h = jnp.dot(x_ref[...], w1_ref[...], preferred_element_type=jnp.float32)
    h = h + b1_ref[...]                       # f32 bias add
    # SiLU in f32 (sigmoid -> EUP, mul -> VPU).
    h = h * jax.nn.sigmoid(h)
    # Cast to bf16 only for the second MXU pass.
    h = h.astype(w2_ref.dtype)
    # linear_2 column tile : bf16 inputs, f32 accumulation.
    out = jnp.dot(h, w2_ref[...], preferred_element_type=jnp.float32)
    out = out + b2_ref[...]
    o_ref[...] = out.astype(o_ref.dtype)


def _num_column_tiles(hidden):
    """2 balanced tiles only on v7x (2 TensorCores/chip); otherwise a single
    untiled grid step is fastest (latency-bound op, fits VMEM even on v5e)."""
    try:
        kind = jax.devices()[0].device_kind.lower()
    except Exception:  # pragma: no cover - defensive, keep a working default
        kind = ""
    if "v7" in kind and hidden % 2 == 0 and (hidden // 2) % 128 == 0:
        return 2
    return 1


def prepare_time_embedding_params(w1_torch, b1_torch, w2_torch, b2_torch):
    """One-time conversion of PyTorch-layout params (weight [out, in] f32,
    bias [out] f32) to kernel layout: bf16 [in, out] weights, f32 [1, out]
    biases.  Do this at model init, NOT per forward call — hoisting this cast
    off the per-call critical path is the single biggest HBM-traffic saving."""
    w1 = jnp.asarray(w1_torch).T.astype(jnp.bfloat16)
    w2 = jnp.asarray(w2_torch).T.astype(jnp.bfloat16)
    b1 = jnp.reshape(jnp.asarray(b1_torch), (1, -1)).astype(jnp.float32)
    b2 = jnp.reshape(jnp.asarray(b2_torch), (1, -1)).astype(jnp.float32)
    return w1, b1, w2, b2


def time_embedding(x, w1, b1, w2, b2, *, n_tiles=None):
    """TimeEmbedding forward: SiLU(x @ w1 + b1) @ w2 + b2.

    x : [B, n_embd] (any float dtype; output keeps x.dtype)
    w1: [n_embd, 4n]  bf16   (prepared once via prepare_time_embedding_params)
    b1: [1, 4n]       f32
    w2: [4n, 4n]      bf16
    b2: [1, 4n]       f32
    """
    B, n_embd = x.shape
    hidden = w1.shape[1]
    assert w2.shape == (hidden, hidden)
    assert b1.shape == (1, hidden) and b2.shape == (1, hidden)

    if n_tiles is None:
        n_tiles = _num_column_tiles(hidden)
    assert hidden % n_tiles == 0
    tn = hidden // n_tiles

    # bf16 activations for the MXU; weights are already bf16 so this tiny cast
    # (plus the pad/slice below) fuses under the enclosing jit.
    xb = x.astype(jnp.bfloat16)

    # Pad the tiny batch up to a full sublane tile so the output store is an
    # unmasked full-tile store; pad rows are sliced off after the call.
    B_pad = max(8, ((B + 7) // 8) * 8)
    if B_pad != B:
        xb = jnp.pad(xb, ((0, B_pad - B), (0, 0)))

    # Explicit VMEM budget: double-buffered blocks + headroom for in-kernel
    # intermediates.  (Feedback: ~12-16 MiB untiled at SD sizes on v5e.)
    blk_bytes = (B_pad * n_embd * 2          # x (bf16)
                 + n_embd * hidden * 2       # W1 (bf16, resident)
                 + hidden * 4                # b1 (f32)
                 + hidden * tn * 2           # W2 tile (bf16)
                 + tn * 4                    # b2 tile (f32)
                 + B_pad * tn * x.dtype.itemsize)  # out tile
    vmem_limit = int(2 * blk_bytes + (4 << 20))

    cost = pl.CostEstimate(
        flops=2 * B_pad * (n_tiles * n_embd * hidden + hidden * hidden),
        transcendentals=n_tiles * B_pad * hidden,
        bytes_accessed=(xb.size * 2 + w1.size * 2 + w2.size * 2
                        + b1.size * 4 + b2.size * 4
                        + B_pad * hidden * x.dtype.itemsize),
    )

    out_padded = pl.pallas_call(
        _time_embedding_kernel,
        out_shape=jax.ShapeDtypeStruct((B_pad, hidden), x.dtype),
        grid=(n_tiles,),
        in_specs=[
            pl.BlockSpec((B_pad, n_embd), lambda j: (0, 0)),   # x   (resident)
            pl.BlockSpec((n_embd, hidden), lambda j: (0, 0)),  # W1  (resident)
            pl.BlockSpec((1, hidden), lambda j: (0, 0)),       # b1  (resident)
            pl.BlockSpec((hidden, tn), lambda j: (0, j)),      # W2  (per tile)
            pl.BlockSpec((1, tn), lambda j: (0, j)),           # b2  (per tile)
        ],
        out_specs=pl.BlockSpec((B_pad, tn), lambda j: (0, j)),
        compiler_params=pltpu.CompilerParams(
            dimension_semantics=(("parallel",) if n_tiles > 1 else ("arbitrary",)),
            vmem_limit_bytes=vmem_limit),
        cost_estimate=cost,
    )(xb, w1, b1, w2, b2)

    return out_padded[:B]


def reference(x, w1_torch, b1_torch, w2_torch, b2_torch):
    """Pure-JAX f32 reference with PyTorch nn.Linear layout (weight [out,in])."""
    h = x @ w1_torch.T + b1_torch
    h = h * jax.nn.sigmoid(h)
    return h @ w2_torch.T + b2_torch


if __name__ == "__main__":
    # Small shapes consistent with the module: batch=2, n_embd=32 -> hidden=128.
    B, n_embd = 2, 32
    hidden = 4 * n_embd

    key = jax.random.PRNGKey(0)
    kx, kw1, kb1, kw2, kb2 = jax.random.split(key, 5)

    x = jax.random.normal(kx, (B, n_embd), dtype=jnp.float32)
    # Deterministic synthetic parameters in PyTorch nn.Linear layout.
    w1_t = jax.random.normal(kw1, (hidden, n_embd), dtype=jnp.float32) * 0.05
    b1_t = jax.random.normal(kb1, (hidden,), dtype=jnp.float32) * 0.05
    w2_t = jax.random.normal(kw2, (hidden, hidden), dtype=jnp.float32) * 0.05
    b2_t = jax.random.normal(kb2, (hidden,), dtype=jnp.float32) * 0.05

    # One-time parameter preparation (weight casts hoisted out of forward).
    w1, b1, w2, b2 = jax.block_until_ready(
        prepare_time_embedding_params(w1_t, b1_t, w2_t, b2_t))

    # jit so the pad / slice / x->bf16 cast fuse around the single kernel launch.
    fwd = jax.jit(time_embedding)
    out = jax.block_until_ready(fwd(x, w1, b1, w2, b2))

    ref = reference(x, w1_t, b1_t, w2_t, b2_t)
    assert out.shape == (B, hidden), out.shape
    # Looser tolerance: weights/activations travel in bf16 (f32 accumulation).
    assert jnp.allclose(out, ref, atol=1e-2, rtol=1e-2), (
        float(jnp.max(jnp.abs(out - ref))))

    print("KERNEL_OK")
</pallas_src>

<mosaic_0001>
module attributes {stable_mosaic.version = 11 : i64} {
  func.func @_time_embedding_kernel(%arg0: i32, %arg1: memref<8x32xbf16, #tpu.memory_space<vmem>>, %arg2: memref<32x128xbf16, #tpu.memory_space<vmem>>, %arg3: memref<1x128xf32, #tpu.memory_space<vmem>>, %arg4: memref<128x128xbf16, #tpu.memory_space<vmem>>, %arg5: memref<1x128xf32, #tpu.memory_space<vmem>>, %arg6: memref<8x128xf32, #tpu.memory_space<vmem>>) attributes {dimension_semantics = [#tpu.dimension_semantics<arbitrary>], iteration_bounds = array<i64: 1>, scalar_prefetch = 0 : i64, scratch_operands = 0 : i64, tpu.core_type = #tpu.core_type<tc>, window_params = [{pipeline_mode = #tpu.pipeline_mode<synchronous>, transform_indices = @transform_0, window_bounds = array<i64: 8, 32>}, {pipeline_mode = #tpu.pipeline_mode<synchronous>, transform_indices = @transform_1, window_bounds = array<i64: 32, 128>}, {pipeline_mode = #tpu.pipeline_mode<synchronous>, transform_indices = @transform_2, window_bounds = array<i64: 1, 128>}, {transform_indices = @transform_3, window_bounds = array<i64: 128, 128>}, {transform_indices = @transform_4, window_bounds = array<i64: 1, 128>}, {transform_indices = @transform_5, window_bounds = array<i64: 8, 128>}]} {
    %c0 = arith.constant 0 : index
    %c0_0 = arith.constant 0 : index
    %0 = vector.load %arg1[%c0, %c0_0] : memref<8x32xbf16, #tpu.memory_space<vmem>>, vector<8x32xbf16>
    %c0_1 = arith.constant 0 : index
    %c0_2 = arith.constant 0 : index
    %1 = vector.load %arg2[%c0_1, %c0_2] : memref<32x128xbf16, #tpu.memory_space<vmem>>, vector<32x128xbf16>
    %cst = arith.constant dense<0.000000e+00> : vector<8x128xf32>
    %2 = tpu.matmul %0, %1, %cst {dimension_numbers = #tpu.dot_dimension_numbers<[1], [0], [0], [1], [0, 0, 1, 1], [], []>} : vector<8x32xbf16>, vector<32x128xbf16>, vector<8x128xf32> -> vector<8x128xf32>
    %c0_3 = arith.constant 0 : index
    %c0_4 = arith.constant 0 : index
    %3 = vector.load %arg3[%c0_3, %c0_4] : memref<1x128xf32, #tpu.memory_space<vmem>>, vector<1x128xf32>
    %4 = vector.broadcast %3 : vector<1x128xf32> to vector<8x128xf32>
    %5 = arith.addf %2, %4 : vector<8x128xf32>
    %6 = arith.negf %5 : vector<8x128xf32>
    %7 = math.exp %6 : vector<8x128xf32>
    %cst_5 = arith.constant 1.000000e+00 : f32
    %8 = vector.broadcast %cst_5 : f32 to vector<8x128xf32>
    %9 = arith.addf %8, %7 : vector<8x128xf32>
    %10 = arith.divf %8, %9 : vector<8x128xf32>
    %11 = arith.mulf %5, %10 : vector<8x128xf32>
    %12 = arith.truncf %11 : vector<8x128xf32> to vector<8x128xbf16>
    %c0_6 = arith.constant 0 : index
    %c0_7 = arith.constant 0 : index
    %13 = vector.load %arg4[%c0_6, %c0_7] : memref<128x128xbf16, #tpu.memory_space<vmem>>, vector<128x128xbf16>
    %cst_8 = arith.constant dense<0.000000e+00> : vector<8x128xf32>
    %14 = tpu.matmul %12, %13, %cst_8 {dimension_numbers = #tpu.dot_dimension_numbers<[1], [0], [0], [1], [0, 0, 1, 1], [], []>} : vector<8x128xbf16>, vector<128x128xbf16>, vector<8x128xf32> -> vector<8x128xf32>
    %c0_9 = arith.constant 0 : index
    %c0_10 = arith.constant 0 : index
    %15 = vector.load %arg5[%c0_9, %c0_10] : memref<1x128xf32, #tpu.memory_space<vmem>>, vector<1x128xf32>
    %16 = vector.broadcast %15 : vector<1x128xf32> to vector<8x128xf32>
    %17 = arith.addf %14, %16 : vector<8x128xf32>
    %c0_11 = arith.constant 0 : index
    %c0_12 = arith.constant 0 : index
    %18 = vector.load %arg6[%c0_11, %c0_12] : memref<8x128xf32, #tpu.memory_space<vmem>>, vector<8x128xf32>
    tpu.vector_store %arg6[%c0_11, %c0_12], %17 {strides = array<i32>} : memref<8x128xf32, #tpu.memory_space<vmem>>, vector<8x128xf32>,
    return
  }
  func.func @transform_0(%arg0: i32) -> (i32, i32) {
    %c0_i32 = arith.constant 0 : i32
    %c0_i32_0 = arith.constant 0 : i32
    %c0_i32_1 = arith.constant 0 : i32
    return %c0_i32, %c0_i32_0 : i32, i32
  }
  func.func @transform_1(%arg0: i32) -> (i32, i32) {
    %c0_i32 = arith.constant 0 : i32
    %c0_i32_0 = arith.constant 0 : i32
    %c0_i32_1 = arith.constant 0 : i32
    return %c0_i32, %c0_i32_0 : i32, i32
  }
  func.func @transform_2(%arg0: i32) -> (i32, i32) {
    %c0_i32 = arith.constant 0 : i32
    %c0_i32_0 = arith.constant 0 : i32
    %c0_i32_1 = arith.constant 0 : i32
    return %c0_i32, %c0_i32_0 : i32, i32
  }
  func.func @transform_3(%arg0: i32) -> (i32, i32) {
    %c0_i32 = arith.constant 0 : i32
    %c0_i32_0 = arith.constant 0 : i32
    return %c0_i32, %arg0 : i32, i32
  }
  func.func @transform_4(%arg0: i32) -> (i32, i32) {
    %c0_i32 = arith.constant 0 : i32
    %c0_i32_0 = arith.constant 0 : i32
    return %c0_i32, %arg0 : i32, i32
  }
  func.func @transform_5(%arg0: i32) -> (i32, i32) {
    %c0_i32 = arith.constant 0 : i32
    %c0_i32_0 = arith.constant 0 : i32
    return %c0_i32, %arg0 : i32, i32
  }
}

</mosaic_0001>

<bundles_post_ra>
// kernel: time_embedding.1
= control target key start
LH: loop header
LB: loop body
LE: loop exit
PB: predicated region body
PF: predicated region fallthrough
CT: control target
= control target key end

     0   :  { %10 = vsyncpa [#allocation3], 0  ;;  %s437_s0 = inlined_call_operand.vmem [shape: bf16[8,32], index: 0, kind: input, shape index: {}]   ;;  %s438_s1 = inlined_call_operand.hbm [shape: bf16[32,128], index: 1, kind: input, shape index: {}]   ;;  %s439_s2 = inlined_call_operand.vmem [shape: f32[1,128], index: 2, kind: input, shape index: {}]   ;;  %s440_s3 = inlined_call_operand.hbm [shape: bf16[128,128], index: 3, kind: input, shape index: {}]   ;;  %s441_s4 = inlined_call_operand.vmem [shape: f32[1,128], index: 4, kind: input, shape index: {}]   ;;  %s442_s5 = inlined_call_operand.vmem [shape: f32[8,128], index: 5, kind: output, shape index: {}]  }
   0x1   :  { %11 = vsyncpa [#allocation5], 0  ;;  %s365_s18 = smov [#allocation2]   ;;  %s317_s22 = scalar_lea.hbm %s438_s1, 256 }
   0x2   :  { %s19_s19 = sshll.u32 %s365_s18, 4  ;;  %p318_p0 = scmp.ne.s32.totalorder %s438_s1, %s317_s22  ;;  %s20_s19 = int_to_ptr.vmem [resolvable:$true] %s19_s19 }
   0x3   :  { %p321_p1 = scmp.lt.u32.totalorder %s317_s22, %s438_s1 }
   0x5   :  { %p323_p2 = pnand %p321_p1, %p318_p0 }
   0x7   :  { %326 = shalt.err (!%p323_p2)
}
   0x8   :  { %s327_s27 = scalar_lea.vmem %s20_s19, 256  ;;  %p332_p4 = scmp.lt.s32.totalorder %s20_s19, %s20_s19 }
   0x9   :  { %p328_p3 = scmp.ne.s32.totalorder %s20_s19, %s327_s27  ;;  %p333_p5 = scmp.lt.s32.totalorder %s327_s27, %s327_s27 }
   0xb   :  { %p334_p6 = por %p333_p5, %p332_p4 }
   0xd   :  { %p335_p7 = pnand %p334_p6, %p328_p3 }
   0xf   :  { %338 = shalt.err (!%p335_p7)
}
  0x10   :  { %s366_s28 = smov 64   ;;  %s367_s29 = smov 4  }
  0x11   :  { %25 = dma.hbm_to_vmem [thread:$0]  %s438_s1, 256, %s20_s19, [#allocation3], %s366_s28, %s366_s28, %s367_s29  }
  0x12   :  { %s368_s7 = smov [#allocation4]   ;;  %s339_s11 = scalar_lea.hbm %s440_s3, 1024 }
  0x13   :  { %s33_s8 = sshll.u32 %s368_s7, 4  ;;  %p340_p8 = scmp.ne.s32.totalorder %s440_s3, %s339_s11  ;;  %s34_s8 = int_to_ptr.vmem [resolvable:$true] %s33_s8 }
  0x14   :  { %p343_p9 = scmp.lt.u32.totalorder %s339_s11, %s440_s3 }
  0x16   :  { %p345_p10 = pnand %p343_p9, %p340_p8 }
  0x18   :  { %348 = shalt.err (!%p345_p10)
}
  0x19   :  { %s349_s16 = scalar_lea.vmem %s34_s8, 1024  ;;  %p354_p12 = scmp.lt.s32.totalorder %s34_s8, %s34_s8 }
  0x1a   :  { %p350_p11 = scmp.ne.s32.totalorder %s34_s8, %s349_s16  ;;  %p355_p13 = scmp.lt.s32.totalorder %s349_s16, %s349_s16 }
  0x1c   :  { %p356_p0 = por %p355_p13, %p354_p12 }
  0x1e   :  { %p357_p1 = pnand %p356_p0, %p350_p11 }
  0x20   :  { %360 = shalt.err (!%p357_p1)
}
  0x21   :  { %39 = dma.hbm_to_vmem [thread:$0]  %s440_s3, 1024, %s34_s8, [#allocation5], %s366_s28, %s366_s28, %s367_s29  }
  0x22   :  { %361 = dma.done.wait [#allocation3], 256  }
  0x23   :  { %362 = vsyncadd [#allocation3], 4294967040 }
  0x24   :  { %363 = dma.done.wait [#allocation5], 1024  }
  0x25   :  { %364 = vsyncadd [#allocation5], 4294966272  ;;  %v369_v0 = vmov 0.0   ;;  %vm370_vm0 = vmmov 0   ;;  %v303_v1 = vld [vmem:[#allocation2] sm:$0xff]   ;;  %v304_v2 = vld [vmem:[#allocation2 + $0x8] sm:$0xff]  }
  0x26   :  { %269 = vmatprep.subr.bf16.mxu0 %v369_v0  ;;  %273 = vmatprep.mubr.msk.bf16.mxu0 %vm370_vm0, %v369_v0  ;;  %vm73_vm1 = vcmask 261120   ;;  %v49_v3 = vld [vmem:[%s437_s0] sm:$0xf]  ;;  %v305_v4 = vld [vmem:[#allocation4] sm:$0xff]   ;;  %v306_v5 = vld [vmem:[#allocation4 + $0x8] sm:$0xff]  }
  0x27   :  { %277 = vmatprep.subr.bf16.mxu1 %v369_v0  ;;  %293 = vmatprep.mubr.msk.bf16.mxu1 %vm370_vm0, %v369_v0  ;;  %v307_v6 = vld [vmem:[#allocation4 + $0x10] sm:$0xff]   ;;  %v308_v7 = vld [vmem:[#allocation4 + $0x18] sm:$0xff]   ;;  %v309_v8 = vld [vmem:[#allocation4 + $0x20] sm:$0xff]  }
  0x28   :  { %270 = vmatpush3.bf16.msra.mxu0 %v303_v1  ;;  %278 = vmatpush3.bf16.msra.mxu1 %v305_v4  ;;  %v310_v9 = vld [vmem:[#allocation4 + $0x28] sm:$0xff]   ;;  %v311_v10 = vld [vmem:[#allocation4 + $0x30] sm:$0xff]   ;;  %v312_v11 = vld [vmem:[#allocation4 + $0x38] sm:$0xff]  }
  0x29   :  { %271 = vmatprep.subr.bf16.mxu0 %v369_v0  ;;  %279 = vmatprep.subr.bf16.mxu1 %v369_v0  ;;  %v243_v12 = vld [vmem:[%s439_s2] ss:$0 sm:$0xff] }
  0x2a   :  { %v248_v24 = vld [vmem:[%s441_s4] ss:$0 sm:$0xff] }
  0x2c   :  { %272 = vmatpush3.bf16.msra.mxu0 %v304_v2  ;;  %280 = vmatpush3.bf16.msra.mxu1 %v306_v5 }
  0x2d   :  { %281 = vmatprep.subr.bf16.mxu1 %v369_v0 }
  0x2f   :  { %274 = vmatmul.mubr.msk.bf16.vlgmr.msra.gmra.mrb[0].mxu0 %vm73_vm1, %v49_v3 }
  0x30   :  { %282 = vmatpush3.bf16.msra.mxu1 %v307_v6 }
  0x31   :  { %283 = vmatprep.subr.bf16.mxu1 %v369_v0 }
  0x34   :  { %284 = vmatpush3.bf16.msra.mxu1 %v308_v7 }
  0x35   :  { %285 = vmatprep.subr.bf16.mxu1 %v369_v0 }
  0x38   :  { %286 = vmatpush3.bf16.msra.mxu1 %v309_v8 }
  0x39   :  { %287 = vmatprep.subr.bf16.mxu1 %v369_v0 }
  0x3c   :  { %288 = vmatpush3.bf16.msra.mxu1 %v310_v9 }
  0x3d   :  { %289 = vmatprep.subr.bf16.mxu1 %v369_v0 }
  0x40   :  { %290 = vmatpush3.bf16.msra.mxu1 %v311_v10 }
  0x41   :  { %291 = vmatprep.subr.bf16.mxu1 %v369_v0 }
  0x44   :  { %292 = vmatpush3.bf16.msra.mxu1 %v312_v11 }
 0x102   :  { %v111_v13 = vpop.f32.mrb[0].mxu0 }
 0x103   :  { %v112_v14 = vadd.f32 %v243_v12, %v111_v13  ;;  %v275_v15 = vpop.f32.mrb[1].mxu0 }
 0x104   :  { %v114_v16 = vpop.f32.mrb[2].mxu0 }
 0x105   :  { %v247_v17 = vmul.f32 -1.442695, %v112_v14  ;;  %v276_v18 = vpop.f32.mrb[3].mxu0 }
 0x107   :  { %313 = vpow2.f32 %v247_v17 }
 0x111   :  { %v314_v19 = vpop.eup %313 }
 0x112   :  { %v120_v20 = vadd.f32 1.0, %v314_v19 }
 0x114   :  { %315 = vrcp.f32 %v120_v20 }
 0x11e   :  { %v316_v21 = vpop.eup %315 }
 0x11f   :  { %v123_v22 = vmul.f32 %v316_v21, %v112_v14 }
 0x121   :  { %v124_v23 = vpack.c.bf16 %v123_v22, %v123_v22 }
 0x123   :  { %294 = vmatmul.mubr.bf16.vlgmr.msra.gmra.mrb[0].mxu1 %v124_v23 }
 0x1f6   :  { %v230_v25 = vpop.f32.mrb[0].mxu1 }
 0x1f7   :  { %v231_v26 = vadd.f32 %v248_v24, %v230_v25  ;;  %v295_v27 = vpop.f32.mrb[1].mxu1 }
 0x1f8   :  { %v233_v28 = vpop.f32.mrb[2].mxu1 }
 0x1f9   :  { %236 = vst [vmem:[%s442_s5] sm:$0xff] %v231_v26  ;;  %v296_v29 = vpop.f32.mrb[3].mxu1 }
 0x1fa   :  { %241 = vsyncpa [#allocation3], 1 }
 0x1fb   :  { %242 = vsyncpa [#allocation5], 1 }

</bundles_post_ra>
